<compile_context>
chip_gen: v5e
topology: v5e:2x2
jax: 0.10.0
libtpu: 0.0.40
codegen_flags: <defaults>
</compile_context>

<pallas_src>
import math

import jax
import jax.numpy as jnp
from jax import lax
from jax.experimental import pallas as pl
from jax.experimental.pallas import tpu as pltpu

BN_EPS = 1e-5
VMEM_LIMIT = 32 * 1024 * 1024          # scoped-VMEM limit: safe on v5e/v6e/v7x
BLOCK_BUDGET = 2 * 1024 * 1024         # target bytes per (Cin, TILE, W) input block


def _choose_h_tiling(h, cin, w, wout):
    """Pick the H-tile: full H per sample when it fits the budget (common /
    test case -> no padding, no final slice); otherwise a large multiple-of-8
    tile whose lane-dense output block (TILE*Wout) is a 128-multiple."""
    row_bytes = cin * w * 4                          # f32 input rows
    if h * row_bytes <= BLOCK_BUDGET:
        return h, h                                  # tile_h, h_pad
    unit = max(8, 128 // math.gcd(wout, 128))        # keeps (8,128) rules valid
    tile = max(unit, (BLOCK_BUDGET // row_bytes) // unit * unit)
    h_pad = ((h + tile - 1) // tile) * tile
    return tile, h_pad


def _conv_tile(x_ref, wT_ref):
    """Fused (1, fs) conv of one (sample, H-tile) slab as a single MXU matmul.

    x_ref : (1, Cin, TILE, W)  NCHW slab (one n, TILE rows of H)
    wT_ref: (Cout, fs*Cin)     bf16 taps, column index = k*Cin + ci
    returns (Cout, TILE*Wout) float32
    """
    # Cast once, right after load, so the im2col slices/concat/reshape move
    # half-width data (the prologue vld/vst, not the MXU, binds here).
    x = x_ref[0].astype(jnp.bfloat16)                 # (Cin, TILE, W)
    cin, tile, w = x.shape
    cout, kfc = wT_ref.shape
    fs = kfc // cin
    wout = w - fs + 1
    # im2col along the filter axis (k major, ci minor) to match wT's columns.
    xcol = jnp.concatenate([x[:, :, k:k + wout] for k in range(fs)], axis=0)
    xcol = xcol.reshape(kfc, tile * wout)
    # One MXU push, f32 accumulate; result is already lane-dense (Cout, rows).
    return jnp.dot(wT_ref[...], xcol, preferred_element_type=jnp.float32)


def _stats_kernel(x_ref, wT_ref, stats_ref):
    """Pass 1: conv + per-channel sum / sum-of-squares, accumulated in-kernel
    across the H-tile grid axis (output block resident across that axis)."""
    @pl.when(pl.program_id(1) == 0)
    def _():
        stats_ref[...] = jnp.zeros_like(stats_ref)

    y = _conv_tile(x_ref, wT_ref)                      # (Cout, TILE*Wout)
    s = jnp.sum(y, axis=1, keepdims=True)              # (Cout, 1)
    ss = jnp.sum(y * y, axis=1, keepdims=True)         # (Cout, 1)
    stats_ref[0] = stats_ref[0] + jnp.concatenate([s, ss], axis=1)


def _apply_kernel(x_ref, wT_ref, scale_ref, shift_ref, o_ref):
    """Pass 2: recompute conv, apply folded BN (scale/shift) + ReLU,
    store a lane-dense (Cout, TILE*Wout) block."""
    y = _conv_tile(x_ref, wT_ref)                      # (Cout, TILE*Wout)
    y = y * scale_ref[...] + shift_ref[...]            # folded train-mode BN
    o_ref[0] = jnp.maximum(y, 0.0).astype(o_ref.dtype)


@jax.jit
def slot_forward(x_nchw, w_oihw, gamma, beta):
    """x: (N, Cin, H, W), w: (Cout, Cin, 1, fs) -> (N, Cout, H, W - fs + 1)."""
    n, cin, h, w = x_nchw.shape
    cout, _, _kh, fs = w_oihw.shape
    wout = w - fs + 1

    tile_h, h_pad = _choose_h_tiling(h, cin, w, wout)
    n_h = h_pad // tile_h
    # Common path (test shapes): h_pad == h -> no pad copy, no final slice.
    # Padded rows (fallback only) give exactly-zero conv outputs along W, so
    # they cannot perturb the batch statistics (we divide by the true count).
    x_in = x_nchw if h_pad == h else jnp.pad(
        x_nchw, ((0, 0), (0, 0), (0, h_pad - h), (0, 0)))

    # Weight as (Cout, fs*Cin) bf16 taps, column index = k*Cin + ci.
    wT = jnp.transpose(w_oihw[:, :, 0, :], (0, 2, 1)).reshape(cout, fs * cin)
    wT = wT.astype(jnp.bfloat16)

    # -------- pass 1: conv statistics, accumulated over the H-tile axis -----
    stats = pl.pallas_call(
        _stats_kernel,
        out_shape=jax.ShapeDtypeStruct((n, cout, 2), jnp.float32),
        grid=(n, n_h),
        in_specs=[
            pl.BlockSpec((1, cin, tile_h, w), lambda i, j: (i, 0, j, 0)),
            pl.BlockSpec((cout, fs * cin), lambda i, j: (0, 0)),
        ],
        out_specs=pl.BlockSpec((1, cout, 2), lambda i, j: (i, 0, 0)),
        compiler_params=pltpu.CompilerParams(
            dimension_semantics=("parallel", "arbitrary"),
            vmem_limit_bytes=VMEM_LIMIT),
    )(x_in, wT)

    # -------- fold train-mode BatchNorm (biased var) into scale/shift -------
    totals = jnp.sum(stats, axis=0)                    # (Cout, 2): tiny
    count = jnp.float32(n * h * wout)                  # true count (no pad)
    mean = totals[:, 0] / count
    var = jnp.maximum(totals[:, 1] / count - mean * mean, 0.0)
    inv = lax.rsqrt(var + BN_EPS)
    scale = (gamma * inv).astype(jnp.float32).reshape(cout, 1)
    shift = (beta - mean * gamma * inv).astype(jnp.float32).reshape(cout, 1)

    # -------- pass 2: conv + scale/shift + ReLU, lane-dense output ----------
    # Output block (Cout, TILE*Wout): large dim on lanes -> unmasked stores;
    # reshape back to NCHW is free.  Output kept in the input dtype to match
    # the PyTorch module; emit bf16 here if a downstream consumer accepts it.
    out_flat = pl.pallas_call(
        _apply_kernel,
        out_shape=jax.ShapeDtypeStruct((n, cout, h_pad * wout), x_nchw.dtype),
        grid=(n, n_h),
        in_specs=[
            pl.BlockSpec((1, cin, tile_h, w), lambda i, j: (i, 0, j, 0)),
            pl.BlockSpec((cout, fs * cin), lambda i, j: (0, 0)),
            pl.BlockSpec((cout, 1), lambda i, j: (0, 0)),
            pl.BlockSpec((cout, 1), lambda i, j: (0, 0)),
        ],
        out_specs=pl.BlockSpec((1, cout, tile_h * wout), lambda i, j: (i, 0, j)),
        compiler_params=pltpu.CompilerParams(
            dimension_semantics=("parallel", "parallel"),
            vmem_limit_bytes=VMEM_LIMIT),
    )(x_in, wT, scale, shift)

    out = out_flat.reshape(n, cout, h_pad, wout)
    if h_pad != h:                                     # fallback path only
        out = out[:, :, :h, :]
    return out


def slot_reference(x_nchw, w_oihw, gamma, beta):
    """Pure-JAX reference (conv + train-mode BN + ReLU) for verification."""
    y = lax.conv_general_dilated(
        x_nchw, w_oihw, window_strides=(1, 1), padding="VALID",
        dimension_numbers=("NCHW", "OIHW", "NCHW"))
    mean = jnp.mean(y, axis=(0, 2, 3), keepdims=True)
    var = jnp.mean(jnp.square(y - mean), axis=(0, 2, 3), keepdims=True)
    yn = (y - mean) * lax.rsqrt(var + BN_EPS)
    yn = yn * gamma.reshape(1, -1, 1, 1) + beta.reshape(1, -1, 1, 1)
    return jnp.maximum(yn, 0.0)


if __name__ == "__main__":
    # Small shapes consistent with the module: Slot(nin=4, nout=8, fs=3)
    N, NIN, NOUT, H, W, FS = 2, 4, 8, 16, 16, 3

    key = jax.random.PRNGKey(0)
    kx, kw = jax.random.split(key)

    x = jax.random.normal(kx, (N, NIN, H, W), dtype=jnp.float32)
    # PyTorch conv weight layout (Cout, Cin, 1, fs).
    conv_w = jax.random.normal(kw, (NOUT, NIN, 1, FS), dtype=jnp.float32) * 0.1
    # BatchNorm2d default init: weight (gamma) = 1, bias (beta) = 0.
    gamma = jnp.ones((NOUT,), dtype=jnp.float32)
    beta = jnp.zeros((NOUT,), dtype=jnp.float32)

    out = slot_forward(x, conv_w, gamma, beta)
    out = jax.block_until_ready(out)

    ref = slot_reference(x, conv_w, gamma, beta)
    assert out.shape == (N, NOUT, H, W - FS + 1), out.shape
    # bf16 matmul inputs (f32 accumulation / f32 BN stats) -> 2e-2 tolerance.
    max_err = float(jnp.max(jnp.abs(out - ref)))
    assert jnp.allclose(out, ref, atol=2e-2, rtol=2e-2), max_err

    print("KERNEL_OK")
</pallas_src>

<mosaic_0001>
module attributes {stable_mosaic.version = 11 : i64} {
  func.func @_apply_kernel(%arg0: i32, %arg1: i32, %arg2: memref<1x4x16x16xf32, #tpu.memory_space<vmem>>, %arg3: memref<8x12xbf16, #tpu.memory_space<vmem>>, %arg4: memref<8x1xf32, #tpu.memory_space<vmem>>, %arg5: memref<8x1xf32, #tpu.memory_space<vmem>>, %arg6: memref<1x8x224xf32, #tpu.memory_space<vmem>>) attributes {dimension_semantics = [#tpu.dimension_semantics<parallel>, #tpu.dimension_semantics<parallel>], iteration_bounds = array<i64: 2, 1>, scalar_prefetch = 0 : i64, scratch_operands = 0 : i64, tpu.core_type = #tpu.core_type<tc>, window_params = [{transform_indices = @transform_0, window_bounds = array<i64: 1, 4, 16, 16>}, {pipeline_mode = #tpu.pipeline_mode<synchronous>, transform_indices = @transform_1, window_bounds = array<i64: 8, 12>}, {pipeline_mode = #tpu.pipeline_mode<synchronous>, transform_indices = @transform_2, window_bounds = array<i64: 8, 1>}, {pipeline_mode = #tpu.pipeline_mode<synchronous>, transform_indices = @transform_3, window_bounds = array<i64: 8, 1>}, {transform_indices = @transform_4, window_bounds = array<i64: 1, 8, 224>}]} {
    %c0 = arith.constant 0 : index
    %c0_0 = arith.constant 0 : index
    %c0_1 = arith.constant 0 : index
    %c0_2 = arith.constant 0 : index
    %0 = vector.load %arg2[%c0, %c0_0, %c0_1, %c0_2] : memref<1x4x16x16xf32, #tpu.memory_space<vmem>>, vector<1x4x16x16xf32>
    %1 = vector.shape_cast %0 : vector<1x4x16x16xf32> to vector<4x16x16xf32>
    %2 = arith.truncf %1 : vector<4x16x16xf32> to vector<4x16x16xbf16>
    %3 = vector.extract_strided_slice %2 {offsets = [0, 0, 0], sizes = [4, 16, 14], strides = [1, 1, 1]} : vector<4x16x16xbf16> to vector<4x16x14xbf16>
    %4 = vector.extract_strided_slice %2 {offsets = [0, 0, 1], sizes = [4, 16, 14], strides = [1, 1, 1]} : vector<4x16x16xbf16> to vector<4x16x14xbf16>
    %5 = vector.extract_strided_slice %2 {offsets = [0, 0, 2], sizes = [4, 16, 14], strides = [1, 1, 1]} : vector<4x16x16xbf16> to vector<4x16x14xbf16>
    %6 = tpu.concatenate %3, %4, %5 in 0 : vector<4x16x14xbf16>, vector<4x16x14xbf16>, vector<4x16x14xbf16> -> vector<12x16x14xbf16>
    %7 = vector.shape_cast %6 : vector<12x16x14xbf16> to vector<12x224xbf16>
    %c0_3 = arith.constant 0 : index
    %c0_4 = arith.constant 0 : index
    %8 = vector.load %arg3[%c0_3, %c0_4] : memref<8x12xbf16, #tpu.memory_space<vmem>>, vector<8x12xbf16>
    %cst = arith.constant dense<0.000000e+00> : vector<8x224xf32>
    %9 = tpu.matmul %8, %7, %cst {dimension_numbers = #tpu.dot_dimension_numbers<[1], [0], [0], [1], [0, 0, 1, 1], [], []>} : vector<8x12xbf16>, vector<12x224xbf16>, vector<8x224xf32> -> vector<8x224xf32>
    %c0_5 = arith.constant 0 : index
    %c0_6 = arith.constant 0 : index
    %10 = vector.load %arg4[%c0_5, %c0_6] : memref<8x1xf32, #tpu.memory_space<vmem>>, vector<8x1xf32>
    %11 = vector.broadcast %10 : vector<8x1xf32> to vector<8x224xf32>
    %12 = arith.mulf %9, %11 : vector<8x224xf32>
    %c0_7 = arith.constant 0 : index
    %c0_8 = arith.constant 0 : index
    %13 = vector.load %arg5[%c0_7, %c0_8] : memref<8x1xf32, #tpu.memory_space<vmem>>, vector<8x1xf32>
    %14 = vector.broadcast %13 : vector<8x1xf32> to vector<8x224xf32>
    %15 = arith.addf %12, %14 : vector<8x224xf32>
    %cst_9 = arith.constant 0.000000e+00 : f32
    %16 = vector.broadcast %cst_9 : f32 to vector<8x224xf32>
    %17 = arith.maximumf %15, %16 : vector<8x224xf32>
    %c0_10 = arith.constant 0 : index
    %c0_11 = arith.constant 0 : index
    %c0_12 = arith.constant 0 : index
    %18 = vector.load %arg6[%c0_10, %c0_11, %c0_12] : memref<1x8x224xf32, #tpu.memory_space<vmem>>, vector<1x8x224xf32>
    %19 = vector.shape_cast %18 : vector<1x8x224xf32> to vector<8x224xf32>
    %20 = vector.shape_cast %17 : vector<8x224xf32> to vector<1x8x224xf32>
    tpu.vector_store %arg6[%c0_10, %c0_11, %c0_12], %20 {strides = array<i32>} : memref<1x8x224xf32, #tpu.memory_space<vmem>>, vector<1x8x224xf32>,
    return
  }
  func.func @transform_0(%arg0: i32, %arg1: i32) -> (i32, i32, i32, i32) {
    %c0_i32 = arith.constant 0 : i32
    %c0_i32_0 = arith.constant 0 : i32
    %c0_i32_1 = arith.constant 0 : i32
    return %arg0, %c0_i32, %arg1, %c0_i32_0 : i32, i32, i32, i32
  }
  func.func @transform_1(%arg0: i32, %arg1: i32) -> (i32, i32) {
    %c0_i32 = arith.constant 0 : i32
    %c0_i32_0 = arith.constant 0 : i32
    %c0_i32_1 = arith.constant 0 : i32
    return %c0_i32, %c0_i32_0 : i32, i32
  }
  func.func @transform_2(%arg0: i32, %arg1: i32) -> (i32, i32) {
    %c0_i32 = arith.constant 0 : i32
    %c0_i32_0 = arith.constant 0 : i32
    %c0_i32_1 = arith.constant 0 : i32
    return %c0_i32, %c0_i32_0 : i32, i32
  }
  func.func @transform_3(%arg0: i32, %arg1: i32) -> (i32, i32) {
    %c0_i32 = arith.constant 0 : i32
    %c0_i32_0 = arith.constant 0 : i32
    %c0_i32_1 = arith.constant 0 : i32
    return %c0_i32, %c0_i32_0 : i32, i32
  }
  func.func @transform_4(%arg0: i32, %arg1: i32) -> (i32, i32, i32) {
    %c0_i32 = arith.constant 0 : i32
    %c0_i32_0 = arith.constant 0 : i32
    return %arg0, %c0_i32, %arg1 : i32, i32, i32
  }
}

module attributes {stable_mosaic.version = 11 : i64} {
  func.func @_stats_kernel(%arg0: i32, %arg1: i32, %arg2: memref<1x4x16x16xf32, #tpu.memory_space<vmem>>, %arg3: memref<8x12xbf16, #tpu.memory_space<vmem>>, %arg4: memref<1x8x2xf32, #tpu.memory_space<vmem>>) attributes {dimension_semantics = [#tpu.dimension_semantics<parallel>, #tpu.dimension_semantics<arbitrary>], iteration_bounds = array<i64: 2, 1>, scalar_prefetch = 0 : i64, scratch_operands = 0 : i64, tpu.core_type = #tpu.core_type<tc>, window_params = [{transform_indices = @transform_0, window_bounds = array<i64: 1, 4, 16, 16>}, {pipeline_mode = #tpu.pipeline_mode<synchronous>, transform_indices = @transform_1, window_bounds = array<i64: 8, 12>}, {transform_indices = @transform_2, window_bounds = array<i64: 1, 8, 2>}]} {
    %c0_i32 = arith.constant 0 : i32
    %0 = arith.cmpi eq, %arg1, %c0_i32 : i32
    %1 = arith.extui %0 : i1 to i32
    %c0_i32_0 = arith.constant 0 : i32
    %2 = arith.cmpi ne, %1, %c0_i32_0 : i32
    scf.if %2 {
      %cst_14 = arith.constant 0.000000e+00 : f32
      %25 = vector.broadcast %cst_14 : f32 to vector<1x8x2xf32>
      %c0_15 = arith.constant 0 : index
      %c0_16 = arith.constant 0 : index
      %c0_17 = arith.constant 0 : index
      %26 = vector.load %arg4[%c0_15, %c0_16, %c0_17] : memref<1x8x2xf32, #tpu.memory_space<vmem>>, vector<1x8x2xf32>
      tpu.vector_store %arg4[%c0_15, %c0_16, %c0_17], %25 {strides = array<i32>} : memref<1x8x2xf32, #tpu.memory_space<vmem>>, vector<1x8x2xf32>,
    } else {
    }
    %c0 = arith.constant 0 : index
    %c0_1 = arith.constant 0 : index
    %c0_2 = arith.constant 0 : index
    %c0_3 = arith.constant 0 : index
    %3 = vector.load %arg2[%c0, %c0_1, %c0_2, %c0_3] : memref<1x4x16x16xf32, #tpu.memory_space<vmem>>, vector<1x4x16x16xf32>
    %4 = vector.shape_cast %3 : vector<1x4x16x16xf32> to vector<4x16x16xf32>
    %5 = arith.truncf %4 : vector<4x16x16xf32> to vector<4x16x16xbf16>
    %6 = vector.extract_strided_slice %5 {offsets = [0, 0, 0], sizes = [4, 16, 14], strides = [1, 1, 1]} : vector<4x16x16xbf16> to vector<4x16x14xbf16>
    %7 = vector.extract_strided_slice %5 {offsets = [0, 0, 1], sizes = [4, 16, 14], strides = [1, 1, 1]} : vector<4x16x16xbf16> to vector<4x16x14xbf16>
    %8 = vector.extract_strided_slice %5 {offsets = [0, 0, 2], sizes = [4, 16, 14], strides = [1, 1, 1]} : vector<4x16x16xbf16> to vector<4x16x14xbf16>
    %9 = tpu.concatenate %6, %7, %8 in 0 : vector<4x16x14xbf16>, vector<4x16x14xbf16>, vector<4x16x14xbf16> -> vector<12x16x14xbf16>
    %10 = vector.shape_cast %9 : vector<12x16x14xbf16> to vector<12x224xbf16>
    %c0_4 = arith.constant 0 : index
    %c0_5 = arith.constant 0 : index
    %11 = vector.load %arg3[%c0_4, %c0_5] : memref<8x12xbf16, #tpu.memory_space<vmem>>, vector<8x12xbf16>
    %cst = arith.constant dense<0.000000e+00> : vector<8x224xf32>
    %12 = tpu.matmul %11, %10, %cst {dimension_numbers = #tpu.dot_dimension_numbers<[1], [0], [0], [1], [0, 0, 1, 1], [], []>} : vector<8x12xbf16>, vector<12x224xbf16>, vector<8x224xf32> -> vector<8x224xf32>
    %cst_6 = arith.constant dense<0.000000e+00> : vector<8xf32>
    %13 = vector.multi_reduction <add>, %12, %cst_6 [1] : vector<8x224xf32> to vector<8xf32>
    %14 = vector.shape_cast %13 : vector<8xf32> to vector<8x1xf32>
    %15 = arith.mulf %12, %12 : vector<8x224xf32>
    %cst_7 = arith.constant dense<0.000000e+00> : vector<8xf32>
    %16 = vector.multi_reduction <add>, %15, %cst_7 [1] : vector<8x224xf32> to vector<8xf32>
    %17 = vector.shape_cast %16 : vector<8xf32> to vector<8x1xf32>
    %c0_8 = arith.constant 0 : index
    %c0_9 = arith.constant 0 : index
    %c0_10 = arith.constant 0 : index
    %18 = vector.load %arg4[%c0_8, %c0_9, %c0_10] : memref<1x8x2xf32, #tpu.memory_space<vmem>>, vector<1x8x2xf32>
    %19 = vector.shape_cast %18 : vector<1x8x2xf32> to vector<8x2xf32>
    %20 = tpu.concatenate %14, %17 in 1 : vector<8x1xf32>, vector<8x1xf32> -> vector<8x2xf32>
    %21 = arith.addf %19, %20 : vector<8x2xf32>
    %c0_11 = arith.constant 0 : index
    %c0_12 = arith.constant 0 : index
    %c0_13 = arith.constant 0 : index
    %22 = vector.load %arg4[%c0_11, %c0_12, %c0_13] : memref<1x8x2xf32, #tpu.memory_space<vmem>>, vector<1x8x2xf32>
    %23 = vector.shape_cast %22 : vector<1x8x2xf32> to vector<8x2xf32>
    %24 = vector.shape_cast %21 : vector<8x2xf32> to vector<1x8x2xf32>
    tpu.vector_store %arg4[%c0_11, %c0_12, %c0_13], %24 {strides = array<i32>} : memref<1x8x2xf32, #tpu.memory_space<vmem>>, vector<1x8x2xf32>,
    return
  }
  func.func @transform_0(%arg0: i32, %arg1: i32) -> (i32, i32, i32, i32) {
    %c0_i32 = arith.constant 0 : i32
    %c0_i32_0 = arith.constant 0 : i32
    %c0_i32_1 = arith.constant 0 : i32
    return %arg0, %c0_i32, %arg1, %c0_i32_0 : i32, i32, i32, i32
  }
  func.func @transform_1(%arg0: i32, %arg1: i32) -> (i32, i32) {
    %c0_i32 = arith.constant 0 : i32
    %c0_i32_0 = arith.constant 0 : i32
    %c0_i32_1 = arith.constant 0 : i32
    return %c0_i32, %c0_i32_0 : i32, i32
  }
  func.func @transform_2(%arg0: i32, %arg1: i32) -> (i32, i32, i32) {
    %c0_i32 = arith.constant 0 : i32
    %c0_i32_0 = arith.constant 0 : i32
    %c0_i32_1 = arith.constant 0 : i32
    return %arg0, %c0_i32, %c0_i32_0 : i32, i32, i32
  }
}

</mosaic_0001>

<bundles_post_ra>
// kernel: slot_forward.2
= control target key start
LH: loop header
LB: loop body
LE: loop exit
PB: predicated region body
PF: predicated region fallthrough
CT: control target
= control target key end

     0   :  { %7 = vsyncpa [#allocation3], 0  ;;  %s1330_s0 = inlined_call_operand.hbm [shape: f32[2,4,16,16], index: 0, kind: input, shape index: {}]   ;;  %s1331_s1 = inlined_call_operand.vmem [shape: bf16[8,12], index: 1, kind: input, shape index: {}]   ;;  %s1332_s2 = inlined_call_operand.vmem [shape: f32[2,8,2], index: 2, kind: output, shape index: {}]  }
   0x1   :  { %9 = vsyncpa [#allocation3 + $0x1], 0  ;;  %s1042_s9 = smov 0   ;;  %s1044_s10 = smov 0  }
   0x2   :  { %s1046_s11 = smov 0   ;;  %s1048_s12 = smov 0  }
   0x3   :  { %s1050_s13 = smov 0   ;;  %s1052_s14 = smov 0  }
   0x4 LB: > { %s833_s15 = sadd.s32 4294967295, %s1004_s14   ;;  %s27_s16 = sadd.s32 1, %s1000_s13  ;;  %s1004_s14 = sphi %s1052_s14, %s15_s14   ;;  %s1000_s13 = sphi %s1050_s13, %s1339_s13   ;;  %s996_s12 = sphi %s1048_s12, %s1338_s12   ;;  %s992_s11 = sphi %s1046_s11, %s1337_s11   ;;  %s988_s10 = sphi %s1044_s10, %s1336_s10   ;;  %s984_s9 = sphi %s1042_s9, %s1335_s9  }
   0x5   : > { %p29_p0 = scmp.ge.s32.totalorder %s27_s16, 2  ;;  %s36_s17 = sadd.s32 1, %s992_s11 }
   0x6   : > { %p43_p1 = scmp.ne.s32.totalorder %s992_s11, %s988_s10  ;;  %p44_p2 = scmp.eq.s32.totalorder %s1004_s14, 0 }
   0x7   : > { %s1341_s16 = smov (%p29_p0, %s27_s16), 0  ;;  %p49_p4 = scmp.ne.s32.totalorder %s988_s10, %s984_s9 }
   0x8   : > { %p1078_p3 = por %p44_p2, %p43_p1  ;;  %s31_s19 = ssub.s32 %s1000_s13, %s1341_s16 }
   0x9   : > { %p50_p5 = scmp.eq.s32.totalorder %s833_s15, 0  ;;  %p34_p6 = scmp.eq.s32.totalorder %s31_s19, 0 }
   0xa   : > { %p854_p8 = scmp.lt.s32.totalorder %s1004_s14, 2  ;;  %s123_s22 = sand.u32 1, %s992_s11  }
   0xb   : > { %p1085_p7 = por %p50_p5, %p49_p4  ;;  %s847_s23 = sshll.u32 %s1000_s13, 6 }
   0xc   : > { %s1091_s21 = scalar_select %p34_p6, %s992_s11, %s36_s17  }
   0xd   : > { %s837_s24 = sshll.u32 %s123_s22, 6  ;;  %s134_s27 = scalar_lea.hbm %s1330_s0, %s847_s23 }
   0xe   : > { %s135_s28 = sshll.u32 %s134_s27, 4  ;;  %s127_s29 = scalar_lea.vmem [#allocation2], %s837_s24  ;;  %s136_s28 = int_to_ptr.hbm [resolvable:$true] %s135_s28 }
   0xf   : > { %s137_s30 = sshll.u32 %s127_s29, 4  ;;  %p851_p9 = pnand %p854_p8, %p1078_p3  ;;  %s138_s30 = int_to_ptr.vmem [resolvable:$true] %s137_s30 }
  0x10   : > { %p840_p10 = scmp.ge.s32.totalorder %s1004_s14, 1  ;;  %p145_p11 = scmp.lt.s32.totalorder %s1004_s14, 3 }
  0x11   : > { %s124_s3 = scalar_lea.sflag [#allocation3], %s123_s22  ;;  %s1006_s4 = smov 128  }
  0x12   : > { %s1007_s5 = smov 8   ;;  %p146_p12 = pnand %p840_p10, %p145_p11 }
  0x13   : > { %853 = dma.hbm_to_vmem [thread:$0]  (!%p851_p9), %s136_s28, 1024, %s138_s30, %s124_s3, %s1006_s4, %s1006_s4, %s1007_s5  }
  0x14   : > { %149 = sbr.rel (%p146_p12) target bundleno = 593 (0x251), region = 28  ;;  %s151_s6 = sand.u32 (!%p146_p12), 1, %s988_s10  }
  0x15   : > { %s841_s7 = sshll.u32 (!%p146_p12), %s151_s6, 6  ;;  %s152_s8 = scalar_lea.sflag (!%p146_p12), [#allocation3], %s151_s6 }
  0x16   : > { %s155_s9 = scalar_lea.vmem (!%p146_p12), [#allocation2], %s841_s7 }
  0x19   : > { %979 = dma.done.wait (%p1085_p7), %s152_s8, 1024  }
  0x1a   : > { %981 = vsyncadd (%p1085_p7), %s152_s8, 4294966272  ;;  %v193_v0 = vld [vmem:[%s155_s9 + $0x28] sm:$0xff]  ;;  %v192_v1 = vld [vmem:[%s155_s9 + $0x20] sm:$0xff]  ;;  %s1008_s15 = smov 127   ;;  %s1009_s17 = smov 126   ;;  %vm333_vm0 = vcmask 1047556  }
  0x1b   : > { %v1107_v2 = vpack.c.bf16 %v193_v0, %v193_v0  ;;  %v1109_v3 = vpack.c.bf16 %v192_v1, %v192_v1  ;;  %v188_v4 = vld [vmem:[%s155_s9] sm:$0xff]  ;;  %v195_v6 = vld [vmem:[%s155_s9 + $0x38] sm:$0xff]  ;;  %v194_v7 = vld [vmem:[%s155_s9 + $0x30] sm:$0xff]  ;;  %v1010_v34 = vmov 1983009808   ;;  %s1012_s18 = smov 14  }
  0x1c   : > { %v1113_v5 = vpack.c.bf16 %v188_v4, %v188_v4  ;;  %v190_v8 = vld [vmem:[%s155_s9 + $0x10] sm:$0xff]  ;;  %v1116_v9 = vpack.c.bf16 %v195_v6, %v195_v6  ;;  %v1118_v10 = vpack.c.bf16 %v194_v7, %v194_v7  ;;  %v191_v12 = vld [vmem:[%s155_s9 + $0x18] sm:$0xff]  ;;  %v189_v13 = vld [vmem:[%s155_s9 + $0x8] sm:$0xff]  ;;  %v336_v35 = vunpack.c.l.s4 %v1010_v34  ;;  %s1013_s19 = smov 56   ;;  %s1014_s20 = smov 70  }
  0x1d   : > { %222 = vrot.lane.b32.xlu1 %v1107_v2, %s1008_s15  ;;  %220 = vrot.lane.b32.xlu0 %v1109_v3, %s1008_s15  ;;  %v198_v11 = vpack.c.bf16 %v190_v8, %v190_v8  ;;  %v1122_v14 = vpack.c.bf16 %v191_v12, %v191_v12  ;;  %v1124_v15 = vpack.c.bf16 %v189_v13, %v189_v13  ;;  %v256_v31 = vshrl.u32 %v1109_v3, 16  ;;  %s1015_s22 = smov 40   ;;  %s1016_s23 = smov 54  }
  0x1e   : > { %212 = vrot.lane.b32.xlu2 %v1113_v5, %s1008_s15  ;;  %v248_v27 = vshrl.u32 %v1113_v5, 16  ;;  %v257_v30 = vshrl.u32 %v1118_v10, 16  ;;  %v1149_v47 = vunpack.c.0.s8 %v336_v35  ;;  %v301_v48 = vshrl.u32 %v1116_v9, 16  ;;  %s1017_s24 = smov 42   ;;  %s1018_s25 = smov 84  }
  0x1f   : > { %v249_v26 = vshrl.u32 %v198_v11, 16  ;;  %v246_v36 = vpack.i.b16 %v198_v11, %v1113_v5  ;;  %v300_v49 = vshrl.u32 %v1107_v2, 16  ;;  %v254_v50 = vpack.i.b16 %v1118_v10, %v1109_v3  ;;  %s1019_s26 = smov 28   ;;  %s1020_s27 = smov 98  }
  0x20   : > { %v258_v41 = vpack.i.b16 %v257_v30, %v256_v31  ;;  %v298_v62 = vpack.i.b16 %v1116_v9, %v1107_v2  ;;  %v293_v6 = vshrl.u32 %v1122_v14, 16  ;;  %v292_v7 = vshrl.u32 %v1124_v15, 16  ;;  %s1021_s28 = smov 26   ;;  %s1022_s29 = smov 12  }
  0x21   : > { %v250_v37 = vpack.i.b16 %v249_v26, %v248_v27  ;;  %v302_v63 = vpack.i.b16 %v301_v48, %v300_v49  ;;  %s1023_s30 = smov 82   ;;  %s1024_s3 = smov 68   ;;  %vm659_vm1 = vcmask 113664   ;;  %vm663_vm2 = vcmask 228352  }
  0x22   : > { %s1025_s4 = smov 112   ;;  %vm666_vm3 = vcmask 343040   ;;  %vm669_vm4 = vcmask 457728   ;;  %vm672_vm5 = vcmask 572416   ;;  %vm675_vm6 = vcmask 687104   ;;  %p177_p13 = scmp.lt.s32.totalorder %s996_s12, 1 }
  0x23   : > { %vm687_vm7 = vcmask 97280   ;;  %vm678_vm8 = vcmask 801792   ;;  %vm690_vm9 = vcmask 211968   ;;  %vm681_vm10 = vcmask 916480  }
  0x24   : > { %vm684_vm11 = vcmask 1031168   ;;  %vm709_vm12 = vcmask 1045504   ;;  %vm693_vm13 = vcmask 326656   ;;  %vm696_vm14 = vcmask 441344   ;;  %s1343_s12 = smov (!%p177_p13, %s996_s12), 1 }
  0x25   : > { %226 = vrot.lane.b32.xlu1 %v1116_v9, %s1008_s15  ;;  %224 = vrot.lane.b32.xlu0 %v1118_v10, %s1008_s15  ;;  %vm699_vm15 = vcmask 556032   ;;  %s842_s7 = sshll.u32 %s1343_s12, 3 }
  0x26   : > { %216 = vrot.lane.b32.xlu2 %v198_v11, %s1008_s15 }
  0x2d   : > { %218 = vrot.lane.b32.xlu1 %v1122_v14, %s1008_s15  ;;  %214 = vrot.lane.b32.xlu0 %v1124_v15, %s1008_s15  ;;  %s180_s15 = scalar_lea.vmem %s1332_s2, %s842_s7 }
  0x2e   : > { %236 = vrot.lane.b32.xlu2 %v1109_v3, %s1009_s17 }
  0x35   : > { %238 = vrot.lane.b32.xlu1 %v1107_v2, %s1009_s17  ;;  %240 = vrot.lane.b32.xlu0 %v1118_v10, %s1009_s17  ;;  %v290_v2 = vpack.i.b16 %v1122_v14, %v1124_v15 }
  0x36   : > { %242 = vrot.lane.b32.xlu2 %v1116_v9, %s1009_s17 }
  0x3d   : > { %232 = vrot.lane.b32.xlu1 %v198_v11, %s1009_s17  ;;  %228 = vrot.lane.b32.xlu0 %v1113_v5, %s1009_s17 }
  0x3e   : > { %230 = vrot.lane.b32.xlu2 %v1124_v15, %s1009_s17 }
  0x45   : > { %234 = vrot.lane.b32.xlu0 %v1122_v14, %s1009_s17 }
  0x78   : > { %v213_v16 = vpop.permute.xlu2 %212 }
  0x79   : > { %v264_v20 = vshrl.u32 %v213_v16, 16 }
  0x80   : > { %v217_v19 = vpop.permute.xlu2 %216 }
  0x81   : > { %v265_v21 = vshrl.u32 %v217_v19, 16  ;;  %v262_v28 = vpack.i.b16 %v217_v19, %v213_v16 }
  0x83   : > { %v266_v29 = vpack.i.b16 %v265_v21, %v264_v20  ;;  %v332_v38 = vrot.slane %v262_v28, 4 }
  0x85   : > { %v361_v39 = vrot.slane %v266_v29, 4  ;;  %v334_v51 = vsel %vm333_vm0, %v332_v38, %v246_v36 }
  0x86   : > { %v338_v60 = vperm.slane %v334_v51, %v1149_v47 }
  0x87   : > { %v362_v52 = vsel %vm333_vm0, %v361_v39, %v250_v37 }
  0x88   : > { %v1146_v33 = vpop.permute.xlu2 %236  ;;  %v366_v61 = vperm.slane %v362_v52, %v1149_v47  ;;  %v347_v16 = vrot.slane %v338_v60, 4 }
  0x89   : > { %v285_v12 = vshrl.u32 %v1146_v33, 16 }
  0x8f   : > { %v223_v17 = vpop.permute.xlu1 %222  ;;  %v221_v18 = vpop.permute.xlu0 %220 }
  0x90   : > { %v272_v25 = vshrl.u32 %v221_v18, 16  ;;  %v316_v46 = vshrl.u32 %v223_v17, 16  ;;  %v1163_v4 = vpop.permute.xlu2 %242 }
  0x91   : > { %v330_v28 = vshrl.u32 %v1163_v4, 16 }
  0x97   : > { %v227_v22 = vpop.permute.xlu1 %226  ;;  %v225_v23 = vpop.permute.xlu0 %224 }
  0x98   : > { %v273_v24 = vshrl.u32 %v225_v23, 16  ;;  %v317_v40 = vshrl.u32 %v227_v22, 16  ;;  %v270_v42 = vpack.i.b16 %v225_v23, %v221_v18  ;;  %v314_v53 = vpack.i.b16 %v227_v22, %v223_v17  ;;  %v231_v31 = vpop.permute.xlu2 %230 }
  0x99   : > { %v375_v17 = vrot.slane %v366_v61, 4  ;;  %v1011_v18 = vmov 1934713408  }
  0x9a   : > { %v274_v32 = vpack.i.b16 %v273_v24, %v272_v25  ;;  %v318_v54 = vpack.i.b16 %v317_v40, %v316_v46  ;;  %v339_v55 = vrot.slane %v270_v42, 4  ;;  %v447_v0 = vrot.slane %v314_v53, 4 }
  0x9b   : > { %v350_v19 = vunpack.c.l.s4 %v1011_v18  ;;  %v294_v24 = vpack.i.b16 %v293_v6, %v292_v7  ;;  %v323_v46 = vshrl.u32 %v231_v31, 16 }
  0x9c   : > { %v367_v43 = vrot.slane %v274_v32, 4  ;;  %v475_v1 = vrot.slane %v318_v54, 4  ;;  %v340_v5 = vsel %vm333_vm0, %v339_v55, %v254_v50  ;;  %v448_v20 = vsel %vm333_vm0, %v447_v0, %v298_v62 }
  0x9d   : > { %v344_v22 = vperm.slane %v340_v5, %v1149_v47  ;;  %v1178_v15 = vperm.slane %v448_v20, %v1149_v47  ;;  %v1182_v29 = vunpack.c.0.s8 %v350_v19 }
  0x9e   : > { %v368_v56 = vsel %vm333_vm0, %v367_v43, %v258_v41  ;;  %v476_v21 = vsel %vm333_vm0, %v475_v1, %v302_v63 }
  0x9f   : > { %v219_v44 = vpop.permute.xlu1 %218  ;;  %v215_v45 = vpop.permute.xlu0 %214  ;;  %v372_v3 = vperm.slane %v368_v56, %v1149_v47  ;;  %v480_v27 = vperm.slane %v476_v21, %v1149_v47  ;;  %v345_v30 = vrot.slane %v344_v22, 4  ;;  %v348_v34 = vsel %vm333_vm0, %v344_v22, %v347_v16 }
  0xa0   : > { %v309_v57 = vshrl.u32 %v219_v44, 16  ;;  %v308_v58 = vshrl.u32 %v215_v45, 16  ;;  %v306_v59 = vpack.i.b16 %v219_v44, %v215_v45  ;;  %v1198_v49 = vperm.slane %v348_v34, %v1182_v29 }
  0xa1   : > { %v373_v23 = vrot.slane %v372_v3, 4  ;;  %v376_v35 = vsel %vm333_vm0, %v372_v3, %v375_v17  ;;  %v453_v51 = vrot.slane %v1178_v15, 4  ;;  %v481_v54 = vrot.slane %v480_v27, 4 }
  0xa2   : > { %v310_v8 = vpack.i.b16 %v309_v57, %v308_v58  ;;  %v441_v9 = vrot.slane %v306_v59, 4  ;;  %v1201_v50 = vperm.slane %v376_v35, %v1182_v29  ;;  %v346_v57 = vsel %vm333_vm0, %v345_v30, %v338_v60 }
  0xa3   : > { %v374_v32 = vsel %vm333_vm0, %v373_v23, %v366_v61  ;;  %v577_v1 = vunpack.c.l.b16 %v1198_v49 }
  0xa4   : > { %v469_v25 = vrot.slane %v310_v8, 4  ;;  %v442_v26 = vsel %vm333_vm0, %v441_v9, %v290_v2  ;;  %v1195_v48 = vperm.slane %v374_v32, %v1182_v29  ;;  %v584_v3 = vunpack.c.l.b16 %v1201_v50 }
  0xa5   : > { %v1188_v36 = vperm.slane %v442_v26, %v1149_v47 }
  0xa6   : > { %v470_v37 = vsel %vm333_vm0, %v469_v25, %v294_v24  ;;  %v556_v0 = vunpack.c.l.b16 %v1195_v48 }
  0xa7   : > { %v1168_v10 = vpop.permute.xlu1 %238  ;;  %v241_v11 = vpop.permute.xlu0 %240  ;;  %v455_v55 = vrot.slane %v1188_v36, 4 }
  0xa8   : > { %v286_v13 = vshrl.u32 %v241_v11, 16  ;;  %v329_v38 = vshrl.u32 %v1168_v10, 16  ;;  %v284_v39 = vpack.i.b16 %v241_v11, %v1146_v33  ;;  %v474_v33 = vperm.slane %v470_v37, %v1149_v47 }
  0xa9   : > { %v328_v63 = vpack.i.b16 %v1163_v4, %v1168_v10  ;;  %v456_v4 = vsel %vm333_vm0, %v1178_v15, %v455_v55 }
  0xaa   : > { %v287_v14 = vpack.i.b16 %v286_v13, %v285_v12  ;;  %v398_v56 = vperm.slane %v284_v39, %v1149_v47  ;;  %v331_v59 = vpack.i.b16 %v330_v28, %v329_v38  ;;  %v483_v5 = vrot.slane %v474_v33, 4 }
  0xab   : > { %v482_v9 = vsel %vm333_vm0, %v481_v54, %v474_v33  ;;  %v506_v21 = vperm.slane %v328_v63, %v1149_v47  ;;  %v359_v38 = vrot.slane %v1198_v49, 4 }
  0xac   : > { %v424_v42 = vperm.slane %v287_v14, %v1149_v47  ;;  %v532_v10 = vperm.slane %v331_v59, %v1149_v47  ;;  %v399_v17 = vrot.slane %v398_v56, 4  ;;  %v484_v24 = vsel %vm333_vm0, %v480_v27, %v483_v5 }
  0xad   : > { %v1234_v34 = vperm.slane %v482_v9, %v1182_v29  ;;  %v1237_v27 = vperm.slane %v456_v4, %v1182_v29  ;;  %v1240_v37 = vperm.slane %v484_v24, %v1182_v29  ;;  %v385_v59 = vrot.slane %v1195_v48, 4 }
  0xae   : > { %v425_v58 = vrot.slane %v424_v42, 4  ;;  %v533_v30 = vrot.slane %v532_v10, 4  ;;  %v360_v48 = vsel %vm333_vm0, 0, %v359_v38 }
  0xaf   : > { %v233_v40 = vpop.permute.xlu1 %232  ;;  %v229_v41 = vpop.permute.xlu0 %228  ;;  %v633_v54 = vunpack.c.l.b16 %v1237_v27 }
  0xb0   : > { %v280_v43 = vshrl.u32 %v233_v40, 16  ;;  %v278_v44 = vpack.i.b16 %v233_v40, %v229_v41  ;;  %v279_v45 = vshrl.u32 %v229_v41, 16 }
  0xb2   : > { %v281_v52 = vpack.i.b16 %v280_v43, %v279_v45  ;;  %v393_v53 = vperm.slane %v278_v44, %v1149_v47  ;;  %v352_v45 = vperm.slane %v346_v57, %v1182_v29 }
  0xb4   : > { %v401_v61 = vrot.slane %v393_v53, 4  ;;  %v419_v62 = vperm.slane %v281_v52, %v1149_v47  ;;  %v400_v25 = vsel %vm333_vm0, %v399_v17, %v393_v53  ;;  %v591_v17 = vunpack.c.l.b16 %v360_v48 }
  0xb5   : > { %v406_v39 = vperm.slane %v400_v25, %v1182_v29 }
  0xb6   : > { %v427_v6 = vrot.slane %v419_v62, 4  ;;  %v426_v7 = vsel %vm333_vm0, %v425_v58, %v419_v62  ;;  %v402_v60 = vsel %vm333_vm0, %v398_v56, %v401_v61  ;;  %v640_v58 = vunpack.c.l.b16 %v1240_v37 }
  0xb7   : > { %v235_v8 = vpop.permute.xlu0 %234  ;;  %v432_v11 = vperm.slane %v426_v7, %v1182_v29  ;;  %v410_v2 = vperm.slane %v402_v60, %v1182_v29  ;;  %v411_v61 = vrot.slane %v406_v39, 4  ;;  %v552_v57 = vunpack.c.l.b16 %v406_v39 }
  0xb8   : > { %v324_v12 = vshrl.u32 %v235_v8, 16  ;;  %v322_v13 = vpack.i.b16 %v235_v8, %v231_v31  ;;  %v428_v16 = vsel %vm333_vm0, %v424_v42, %v427_v6  ;;  %v507_v42 = vrot.slane %v506_v21, 4 }
  0xb9   : > { %v557_v18 = vunpack.c.l.b16 %v432_v11  ;;  %v578_v19 = vunpack.c.l.b16 %v410_v2  ;;  %v1225_v20 = vperm.slane %v428_v16, %v1182_v29  ;;  %v437_v33 = vrot.slane %v432_v11, 4 }
  0xba   : > { %v325_v22 = vpack.i.b16 %v324_v12, %v323_v46  ;;  %v501_v23 = vperm.slane %v322_v13, %v1149_v47  ;;  %v612_v46 = vunpack.c.l.b16 %v1234_v34  ;;  %v413_v52 = vrot.slane %v410_v2, 4 }
  0xbb   : > { %v558_v26 = vpack.c.b16 %v557_v18, %v556_v0  ;;  %v579_v14 = vpack.c.b16 %v578_v19, %v577_v1  ;;  %v585_v28 = vunpack.c.l.b16 %v1225_v20  ;;  %v357_v6 = vrot.slane %v352_v45, 4 }
  0xbc   : > { %v509_v31 = vrot.slane %v501_v23, 4  ;;  %v527_v32 = vperm.slane %v325_v22, %v1149_v47  ;;  %v508_v62 = vsel %vm333_vm0, %v507_v42, %v501_v23  ;;  %v414_v5 = vsel %vm333_vm0, 0, %v413_v52 }
  0xbd   : > { %559 = vrot.lane.b32.xlu1 %v558_v26, %s1012_s18  ;;  %580 = vrot.lane.b32.xlu0 %v579_v14, %s1013_s19  ;;  %v586_v35 = vpack.c.b16 %v585_v28, %v584_v3  ;;  %v438_v3 = vsel %vm333_vm0, 0, %v437_v33  ;;  %v551_v7 = vunpack.c.l.b16 %v352_v45  ;;  %v454_v8 = vsel %vm333_vm0, %v453_v51, %v1188_v36 }
  0xbe   : > { %v535_v40 = vrot.slane %v527_v32, 4  ;;  %v534_v47 = vsel %vm333_vm0, %v533_v30, %v527_v32  ;;  %v510_v41 = vsel %vm333_vm0, %v506_v21, %v509_v31  ;;  %v1271_v11 = vperm.slane %v508_v62, %v1182_v29 }
  0xbf   : > { %587 = vrot.lane.b32.xlu2 %v586_v35, %s1014_s20  ;;  %v540_v43 = vperm.slane %v534_v47, %v1182_v29  ;;  %v1248_v44 = vperm.slane %v510_v41, %v1182_v29  ;;  %v386_v2 = vsel %vm333_vm0, 0, %v385_v59  ;;  %v412_v9 = vsel %vm333_vm0, 0, %v411_v61 }
  0xc0   : > { %v536_v49 = vsel %vm333_vm0, %v532_v10, %v535_v40  ;;  %v1275_v4 = vpack.c.b16 %v552_v57, %v551_v7  ;;  %v571_v10 = vunpack.c.l.b16 %v438_v3  ;;  %v592_v12 = vunpack.c.l.b16 %v414_v5 }
  0xc1   : > { %v613_v53 = vunpack.c.l.b16 %v540_v43  ;;  %v634_v55 = vunpack.c.l.b16 %v1248_v44  ;;  %v1256_v56 = vperm.slane %v536_v49, %v1182_v29  ;;  %v358_v13 = vsel %vm333_vm0, 0, %v357_v6 }
  0xc2   : > { %v439_v16 = vrot.slane %v1225_v20, 4  ;;  %v545_v15 = vrot.slane %v540_v43, 4  ;;  %v460_v36 = vperm.slane %v454_v8, %v1182_v29  ;;  %v570_v51 = vunpack.c.l.b16 %v386_v2 }
  0xc3   : > { %v614_v63 = vpack.c.b16 %v613_v53, %v612_v46  ;;  %v635_v0 = vpack.c.b16 %v634_v55, %v633_v54  ;;  %v641_v1 = vunpack.c.l.b16 %v1256_v56  ;;  %v564_v18 = vunpack.c.l.b16 %v412_v9 }
  0xc4   : > { %v387_v19 = vrot.slane %v1201_v50, 4  ;;  %v493_v21 = vrot.slane %v1234_v34, 4  ;;  %v519_v22 = vrot.slane %v1271_v11, 4  ;;  %v572_v23 = vpack.c.b16 %v571_v10, %v570_v51 }
  0xc5   : > { %615 = vrot.lane.b32.xlu1 %v614_v63, %s1009_s17  ;;  %636 = vrot.lane.b32.xlu0 %v635_v0, %s1015_s22  ;;  %v642_v60 = vpack.c.b16 %v641_v1, %v640_v58  ;;  %v593_v24 = vpack.c.b16 %v592_v12, %v591_v17  ;;  %v563_v25 = vunpack.c.l.b16 %v358_v13  ;;  %v440_v26 = vsel %vm333_vm0, 0, %v439_v16 }
  0xc6   : > { %v546_v14 = vsel %vm333_vm0, 0, %v545_v15  ;;  %v465_v20 = vrot.slane %v460_v36, 4  ;;  %v388_v28 = vsel %vm333_vm0, 0, %v387_v19  ;;  %v494_v50 = vsel %vm333_vm0, 0, %v493_v21 }
  0xc7   : > { %643 = vrot.lane.b32.xlu2 %v642_v60, %s1016_s23  ;;  %v565_v29 = vpack.c.b16 %v564_v18, %v563_v25  ;;  %v520_v30 = vsel %vm333_vm0, 0, %v519_v22  ;;  %v599_v31 = vunpack.c.l.b16 %v440_v26  ;;  %v627_v32 = vunpack.c.l.b16 %v546_v14  ;;  %v705_v22 = vld [vmem:[%s1331_s1] sm:$0xf] }
  0xc8   : > { %v466_v34 = vsel %vm333_vm0, 0, %v465_v20  ;;  %v547_v35 = vrot.slane %v1256_v56, 4  ;;  %v521_v38 = vrot.slane %v1248_v44, 4  ;;  %v598_v39 = vunpack.c.l.b16 %v388_v28 }
  0xc9   : > { %v626_v40 = vunpack.c.l.b16 %v494_v50  ;;  %v620_v47 = vunpack.c.l.b16 %v520_v30  ;;  %v495_v41 = vrot.slane %v1240_v37, 4  ;;  %v467_v42 = vrot.slane %v1237_v27, 4 }
  0xca   : > { %v600_v43 = vpack.c.b16 %v599_v31, %v598_v39  ;;  %v619_v46 = vunpack.c.l.b16 %v466_v34  ;;  %v548_v49 = vsel %vm333_vm0, 0, %v547_v35  ;;  %v522_v33 = vsel %vm333_vm0, 0, %v521_v38 }
  0xcb   : > { %v628_v45 = vpack.c.b16 %v627_v32, %v626_v40  ;;  %v496_v44 = vsel %vm333_vm0, 0, %v495_v41  ;;  %v468_v53 = vsel %vm333_vm0, 0, %v467_v42  ;;  %v655_v37 = vunpack.c.l.b16 %v548_v49 }
  0xcc   : > { %v621_v52 = vpack.c.b16 %v620_v47, %v619_v46  ;;  %v648_v27 = vunpack.c.l.b16 %v522_v33  ;;  %v654_v54 = vunpack.c.l.b16 %v496_v44  ;;  %v647_v55 = vunpack.c.l.b16 %v468_v53 }
  0xcd   : > { %573 = vrot.lane.b32.xlu0 %v572_v23, %s1017_s24  ;;  %594 = vrot.lane.b32.xlu1 %v593_v24, %s1018_s25  ;;  %v606_v56 = vunpack.c.l.b16 %v1271_v11  ;;  %v605_v61 = vunpack.c.l.b16 %v460_v36  ;;  %vm702_vm0 = vcmask 670720   ;;  %v1026_v40 = vmov 0.0  }
  0xce   : > { %v656_v58 = vpack.c.b16 %v655_v37, %v654_v54  ;;  %v649_v59 = vpack.c.b16 %v648_v27, %v647_v55 }
  0xcf   : > { %566 = vrot.lane.b32.xlu2 %v565_v29, %s1019_s26  ;;  %v607_v57 = vpack.c.b16 %v606_v56, %v605_v61 }
  0xd5   : > { %601 = vrot.lane.b32.xlu0 %v600_v43, %s1020_s27  ;;  %629 = vrot.lane.b32.xlu1 %v628_v45, %s1021_s28 }
  0xd7   : > { %622 = vrot.lane.b32.xlu2 %v621_v52, %s1022_s29 }
  0xdd   : > { %657 = vrot.lane.b32.xlu0 %v656_v58, %s1023_s30  ;;  %650 = vrot.lane.b32.xlu1 %v649_v59, %s1024_s3 }
  0xdf   : > { %608 = vrot.lane.b32.xlu2 %v607_v57, %s1025_s4 }
 0x119   : > { %v588_v62 = vpop.permute.xlu2 %587 }
 0x121   : > { %v644_v63 = vpop.permute.xlu2 %643 }
 0x129   : > { %v567_v3 = vpop.permute.xlu2 %566 }
 0x12f   : > { %v560_v0 = vpop.permute.xlu1 %559  ;;  %v581_v1 = vpop.permute.xlu0 %580 }
 0x130   : > { %v662_v7 = vsel %vm659_vm1, %v1275_v4, %v560_v0  ;;  %vm740_vm1 = vcmask 785408  }
 0x131   : > { %v623_v60 = vpop.permute.xlu2 %622  ;;  %v665_v8 = vsel %vm663_vm2, %v662_v7, %v567_v3  ;;  %vm186_vm2 = vcmask 15360  }
 0x132   : > { %187 = vst.msk [vmem:[%s180_s15] sm:$0xff] %vm186_vm2, %v1026_v40 }
 0x137   : > { %v616_v5 = vpop.permute.xlu1 %615  ;;  %v637_v6 = vpop.permute.xlu0 %636 }
 0x138   : > { %v689_v4 = vsel %vm687_vm7, %v616_v5, %v623_v60 }
 0x139   : > { %v609_v15 = vpop.permute.xlu2 %608  ;;  %v751_v47 = vld [vmem:[%s180_s15] sm:$0xff] }
 0x13f   : > { %v574_v48 = vpop.permute.xlu0 %573  ;;  %v595_v11 = vpop.permute.xlu1 %594 }
 0x140   : > { %v668_v2 = vsel %vm666_vm3, %v665_v8, %v574_v48  ;;  %vm752_vm3 = vcmask 7168  }
 0x141   : > { %v671_v9 = vsel %vm669_vm4, %v668_v2, %v581_v1 }
 0x142   : > { %v674_v10 = vsel %vm672_vm5, %v671_v9, %v588_v62 }
 0x143   : > { %v677_v12 = vsel %vm675_vm6, %v674_v10, %v595_v11 }
 0x147   : > { %v602_v13 = vpop.permute.xlu0 %601  ;;  %v630_v16 = vpop.permute.xlu1 %629 }
 0x148   : > { %v680_v36 = vsel %vm678_vm8, %v677_v12, %v602_v13  ;;  %v692_v51 = vsel %vm690_vm9, %v689_v4, %v630_v16 }
 0x149   : > { %v683_v17 = vsel %vm681_vm10, %v680_v36, %v609_v15  ;;  %v695_v21 = vsel %vm693_vm13, %v692_v51, %v637_v6 }
 0x14a   : > { %v686_v18 = vsel %vm684_vm11, %v683_v17, %v616_v5  ;;  %v698_v25 = vsel %vm696_vm14, %v695_v21, %v644_v63 }
 0x14b   : > { %v710_v19 = vsel %vm709_vm12, %v686_v18, 0 }
 0x14c   : > { %721 = vmatpush.bf16.msra.mxu0 %v710_v19 }
 0x14f   : > { %v658_v23 = vpop.permute.xlu0 %657  ;;  %v651_v24 = vpop.permute.xlu1 %650  ;;  %843 = vmatmul.msk.bf16.vlgmr.msra.gmra.mxu0 %vm687_vm7, %v705_v22 }
 0x150   : > { %v701_v26 = vsel %vm699_vm15, %v698_v25, %v651_v24 }
 0x151   : > { %v704_v14 = vsel %vm702_vm0, %v701_v26, %v658_v23 }
 0x152   : > { %v712_v20 = vsel %vm709_vm12, %v704_v14, 0 }
 0x153   : > { %734 = vmatpush.bf16.msra.mxu1 %v712_v20 }
 0x156   : > { %844 = vmatmul.msk.bf16.vlgmr.msra.gmra.mxu1 %vm687_vm7, %v705_v22 }
 0x1cc   : > { %v723_v29 = vpop.f32.mrf.mxu0 }
 0x1cd   : > { %v745_v28 = vmul.f32 %v723_v29, %v723_v29 }
 0x1d3   : > { %v736_v50 = vpop.f32.mrf.mxu1 }
 0x1d4   : > { %v741_v30 = vsel %vm740_vm1, %v736_v50, 0.0  ;;  %v746_v31 = vmul.f32 %v736_v50, %v736_v50  ;;  %v725_v32 = vpop.f32.mrf.mxu0 }
 0x1d5   : > { %v742_v34 = vadd.f32 %v741_v30, %v723_v29 }
 0x1d6   : > { %v747_v35 = vsel %vm740_vm1, %v746_v31, 0.0 }
 0x1d7   : > { %743 = vadd.xlane.f32.xlu1 %v742_v34  ;;  %v748_v38 = vadd.f32 %v747_v35, %v745_v28 }
 0x1d9   : > { %749 = vadd.xlane.f32.xlu2 %v748_v38 }
 0x1db   : > { %v738_v39 = vpop.f32.mrf.mxu1 }
 0x24a   : > { %v744_v41 = vpop.xlane.xlu1 %743 }
 0x24c   : > { %v750_v42 = vpop.xlane.xlu2 %749 }
 0x24d   : > { %v753_v43 = vsel %vm752_vm3, %v744_v41, %v750_v42 }
 0x24e   : > { %v754_v45 = vadd.f32 %v753_v43, %v751_v47 }
 0x250   : > { %756 = vst.msk [vmem:[%s180_s15] sm:$0xff] %vm186_vm2, %v754_v45 }
 0x251 PF: > { %s15_s14 = sadd.s32 1, %s1004_s14   ;;  %s1335_s9 = smov %s988_s10 }
 0x252   : > { %p12_p0 = scmp.ge.s32.totalorder %s15_s14, 4   ;;  %s1336_s10 = smov %s992_s11 }
 0x253   : > { %s1337_s11 = smov %s1091_s21  ;;  %s1338_s12 = smov %s1000_s13 }
 0x254   : > { %s1339_s13 = smov %s1341_s16  ;;  %14 = sbr.rel (!%p12_p0) target bundleno = 4 (0x4), region = 72 }
 0x259   :  { %776 = vsyncpa [#allocation3], 1 }
 0x25a   :  { %778 = vsyncpa [#allocation3 + $0x1], 1 }

// kernel: slot_forward.3
= control target key start
LH: loop header
LB: loop body
LE: loop exit
PB: predicated region body
PF: predicated region fallthrough
CT: control target
= control target key end

     0   :  { %9 = vsyncpa [#allocation3], 0  ;;  %s1461_s0 = inlined_call_operand.hbm [shape: f32[2,4,16,16], index: 0, kind: input, shape index: {}]   ;;  %s1462_s1 = inlined_call_operand.vmem [shape: bf16[8,12], index: 1, kind: input, shape index: {}]   ;;  %s1463_s2 = inlined_call_operand.vmem [shape: f32[8,1], index: 2, kind: input, shape index: {}]   ;;  %s1464_s3 = inlined_call_operand.vmem [shape: f32[8,1], index: 3, kind: input, shape index: {}]   ;;  %s1465_s4 = inlined_call_operand.vmem [shape: f32[2,8,224], index: 4, kind: output, shape index: {}]  }
   0x1   :  { %11 = vsyncpa [#allocation3 + $0x1], 0  ;;  %s1141_s15 = smov 0   ;;  %s1143_s16 = smov 0  }
   0x2   :  { %s1145_s17 = smov 0   ;;  %s1147_s18 = smov 0  }
   0x3   :  { %s1149_s19 = smov 0   ;;  %s1151_s20 = smov 0  }
   0x4 LB: > { %s917_s21 = sadd.s32 4294967295, %s1093_s20   ;;  %s29_s22 = sadd.s32 1, %s1089_s19  ;;  %s1093_s20 = sphi %s1151_s20, %s17_s20   ;;  %s1089_s19 = sphi %s1149_s19, %s1472_s19   ;;  %s1085_s18 = sphi %s1147_s18, %s1471_s18   ;;  %s1081_s17 = sphi %s1145_s17, %s1470_s17   ;;  %s1077_s16 = sphi %s1143_s16, %s1469_s16   ;;  %s1073_s15 = sphi %s1141_s15, %s1468_s15  }
   0x5   : > { %p31_p0 = scmp.ge.s32.totalorder %s29_s22, 2  ;;  %s38_s23 = sadd.s32 1, %s1081_s17 }
   0x6   : > { %p45_p1 = scmp.ne.s32.totalorder %s1081_s17, %s1077_s16  ;;  %p46_p2 = scmp.eq.s32.totalorder %s1093_s20, 0 }
   0x7   : > { %s1474_s22 = smov (%p31_p0, %s29_s22), 0  ;;  %p51_p4 = scmp.ne.s32.totalorder %s1077_s16, %s1073_s15 }
   0x8   : > { %p1177_p3 = por %p46_p2, %p45_p1  ;;  %s33_s25 = ssub.s32 %s1089_s19, %s1474_s22 }
   0x9   : > { %p52_p5 = scmp.eq.s32.totalorder %s917_s21, 0  ;;  %p36_p6 = scmp.eq.s32.totalorder %s33_s25, 0 }
   0xa   : > { %p940_p8 = scmp.lt.s32.totalorder %s1093_s20, 2  ;;  %s175_s28 = sand.u32 1, %s1081_s17  }
   0xb   : > { %p1184_p7 = por %p52_p5, %p51_p4  ;;  %s932_s29 = sshll.u32 %s1089_s19, 6 }
   0xc   : > { %s1190_s27 = scalar_select %p36_p6, %s1081_s17, %s38_s23  }
   0xd   : > { %s921_s30 = sshll.u32 %s175_s28, 6  ;;  %s186_s7 = scalar_lea.hbm %s1461_s0, %s932_s29 }
   0xe   : > { %s187_s8 = sshll.u32 %s186_s7, 4  ;;  %s179_s9 = scalar_lea.vmem [#allocation2], %s921_s30  ;;  %s188_s8 = int_to_ptr.hbm [resolvable:$true] %s187_s8 }
   0xf   : > { %s189_s10 = sshll.u32 %s179_s9, 4  ;;  %p937_p9 = pnand %p940_p8, %p1177_p3  ;;  %s190_s10 = int_to_ptr.vmem [resolvable:$true] %s189_s10 }
  0x10   : > { %p924_p10 = scmp.ge.s32.totalorder %s1093_s20, 1  ;;  %p197_p11 = scmp.lt.s32.totalorder %s1093_s20, 3 }
  0x11   : > { %s176_s11 = scalar_lea.sflag [#allocation3], %s175_s28  ;;  %s1095_s12 = smov 128  }
  0x12   : > { %s1096_s13 = smov 8   ;;  %p198_p12 = pnand %p924_p10, %p197_p11 }
  0x13   : > { %939 = dma.hbm_to_vmem [thread:$0]  (!%p937_p9), %s188_s8, 1024, %s190_s10, %s176_s11, %s1095_s12, %s1095_s12, %s1096_s13  }
  0x14   : > { %201 = sbr.rel (%p198_p12) target bundleno = 485 (0x1e5), region = 36  ;;  %s203_s14 = sand.u32 (!%p198_p12), 1, %s1077_s16  }
  0x15   : > { %s925_s15 = sshll.u32 (!%p198_p12), %s203_s14, 6  ;;  %s204_s21 = scalar_lea.sflag (!%p198_p12), [#allocation3], %s203_s14 }
  0x16   : > { %s207_s23 = scalar_lea.vmem (!%p198_p12), [#allocation2], %s925_s15 }
  0x19   : > { %1068 = dma.done.wait (%p1184_p7), %s204_s21, 1024  }
  0x1a   : > { %1070 = vsyncadd (%p1184_p7), %s204_s21, 4294966272  ;;  %v253_v0 = vld [vmem:[%s207_s23 + $0x20] sm:$0xff]  ;;  %v254_v4 = vld [vmem:[%s207_s23 + $0x28] sm:$0xff]  ;;  %s1097_s24 = smov 127   ;;  %s1098_s25 = smov 126   ;;  %vm394_vm0 = vcmask 1047556  }
  0x1b   : > { %v249_v1 = vld [vmem:[%s207_s23] sm:$0xff]  ;;  %v1206_v2 = vpack.c.bf16 %v253_v0, %v253_v0  ;;  %v1210_v5 = vpack.c.bf16 %v254_v4, %v254_v4  ;;  %v255_v6 = vld [vmem:[%s207_s23 + $0x30] sm:$0xff]  ;;  %v256_v8 = vld [vmem:[%s207_s23 + $0x38] sm:$0xff]  ;;  %v1099_v23 = vmov 1983009808   ;;  %s1101_s26 = smov 56  }
  0x1c   : > { %v1208_v3 = vpack.c.bf16 %v249_v1, %v249_v1  ;;  %v251_v7 = vld [vmem:[%s207_s23 + $0x10] sm:$0xff]  ;;  %v1215_v9 = vpack.c.bf16 %v255_v6, %v255_v6  ;;  %v1219_v11 = vpack.c.bf16 %v256_v8, %v256_v8  ;;  %v250_v12 = vld [vmem:[%s207_s23 + $0x8] sm:$0xff]  ;;  %v252_v14 = vld [vmem:[%s207_s23 + $0x18] sm:$0xff]  ;;  %v397_v24 = vunpack.c.l.s4 %v1099_v23  ;;  %s1102_s28 = smov 40   ;;  %s1103_s29 = smov 54  }
  0x1d   : > { %281 = vrot.lane.b32.xlu0 %v1206_v2, %s1097_s24  ;;  %283 = vrot.lane.b32.xlu2 %v1210_v5, %s1097_s24  ;;  %v1217_v10 = vpack.c.bf16 %v251_v7, %v251_v7  ;;  %v1224_v13 = vpack.c.bf16 %v250_v12, %v250_v12  ;;  %v1231_v15 = vpack.c.bf16 %v252_v14, %v252_v14  ;;  %v361_v34 = vshrl.u32 %v1210_v5, 16  ;;  %s1104_s30 = smov 14   ;;  %s1105_s5 = smov 28  }
  0x1e   : > { %273 = vrot.lane.b32.xlu1 %v1208_v3, %s1097_s24  ;;  %v1254_v29 = vunpack.c.0.s8 %v397_v24  ;;  %v362_v33 = vshrl.u32 %v1219_v11, 16  ;;  %v315_v35 = vpack.i.b16 %v1215_v9, %v1206_v2  ;;  %v359_v41 = vpack.i.b16 %v1219_v11, %v1210_v5  ;;  %s1106_s6 = smov 12   ;;  %s1107_s7 = smov 70  }
  0x1f   : > { %v307_v25 = vpack.i.b16 %v1217_v10, %v1208_v3  ;;  %v318_v43 = vshrl.u32 %v1215_v9, 16  ;;  %v317_v46 = vshrl.u32 %v1206_v2, 16  ;;  %v310_v47 = vshrl.u32 %v1217_v10, 16  ;;  %s1108_s8 = smov 26   ;;  %s1109_s9 = smov 84  }
  0x20   : > { %v363_v42 = vpack.i.b16 %v362_v33, %v361_v34  ;;  %v1100_v49 = vmov 1934713408   ;;  %v353_v58 = vshrl.u32 %v1224_v13, 16  ;;  %v354_v59 = vshrl.u32 %v1231_v15, 16  ;;  %s1110_s10 = smov 112   ;;  %s1111_s11 = smov 98  }
  0x21   : > { %v411_v50 = vunpack.c.l.s4 %v1100_v49  ;;  %v351_v12 = vpack.i.b16 %v1231_v15, %v1224_v13  ;;  %s1112_s12 = smov 42   ;;  %s1113_s13 = smov 68   ;;  %vm748_vm1 = vcmask 97280   ;;  %vm720_vm2 = vcmask 113664  }
  0x22   : > { %s1114_s14 = smov 82   ;;  %vm751_vm3 = vcmask 211968   ;;  %vm724_vm4 = vcmask 228352   ;;  %vm727_vm5 = vcmask 343040   ;;  %vm754_vm6 = vcmask 326656   ;;  %p239_p13 = scmp.lt.s32.totalorder %s1085_s18, 1 }
  0x23   : > { %vm730_vm7 = vcmask 457728   ;;  %vm733_vm8 = vcmask 572416   ;;  %vm736_vm9 = vcmask 687104   ;;  %vm739_vm10 = vcmask 801792  }
  0x24   : > { %vm757_vm11 = vcmask 441344   ;;  %vm742_vm12 = vcmask 916480   ;;  %vm745_vm13 = vcmask 1031168   ;;  %vm770_vm14 = vcmask 1045504   ;;  %s1476_s18 = smov (!%p239_p13, %s1085_s18), 1 }
  0x25   : > { %285 = vrot.lane.b32.xlu0 %v1215_v9, %s1097_s24  ;;  %287 = vrot.lane.b32.xlu2 %v1219_v11, %s1097_s24  ;;  %vm760_vm15 = vcmask 556032  }
  0x26   : > { %277 = vrot.lane.b32.xlu1 %v1217_v10, %s1097_s24 }
  0x2d   : > { %297 = vrot.lane.b32.xlu0 %v1206_v2, %s1098_s25  ;;  %275 = vrot.lane.b32.xlu2 %v1224_v13, %s1097_s24 }
  0x2e   : > { %301 = vrot.lane.b32.xlu1 %v1215_v9, %s1098_s25 }
  0x35   : > { %279 = vrot.lane.b32.xlu0 %v1231_v15, %s1097_s24  ;;  %293 = vrot.lane.b32.xlu2 %v1217_v10, %s1098_s25 }
  0x36   : > { %289 = vrot.lane.b32.xlu1 %v1208_v3, %s1098_s25 }
  0x3d   : > { %299 = vrot.lane.b32.xlu0 %v1210_v5, %s1098_s25  ;;  %291 = vrot.lane.b32.xlu2 %v1224_v13, %s1098_s25  ;;  %v1290_v5 = vunpack.c.0.s8 %v411_v50 }
  0x3e   : > { %303 = vrot.lane.b32.xlu1 %v1219_v11, %s1098_s25  ;;  %v309_v11 = vshrl.u32 %v1208_v3, 16 }
  0x40   : > { %v311_v13 = vpack.i.b16 %v310_v47, %v309_v11 }
  0x45   : > { %295 = vrot.lane.b32.xlu0 %v1231_v15, %s1098_s25 }
  0x77   : > { %v284_v16 = vpop.permute.xlu2 %283 }
  0x78   : > { %v377_v37 = vshrl.u32 %v284_v16, 16 }
  0x7f   : > { %v288_v19 = vpop.permute.xlu2 %287 }
  0x80   : > { %v378_v38 = vshrl.u32 %v288_v19, 16  ;;  %v375_v39 = vpack.i.b16 %v288_v19, %v284_v16 }
  0x82   : > { %v379_v45 = vpack.i.b16 %v378_v38, %v377_v37  ;;  %v508_v51 = vrot.slane %v375_v39, 4 }
  0x84   : > { %v536_v2 = vrot.slane %v379_v45, 4  ;;  %v509_v10 = vsel %vm394_vm0, %v508_v51, %v359_v41 }
  0x85   : > { %v1306_v3 = vperm.slane %v509_v10, %v1254_v29 }
  0x87   : > { %v276_v27 = vpop.permute.xlu2 %275 }
  0x88   : > { %v369_v54 = vshrl.u32 %v276_v27, 16 }
  0x8f   : > { %v282_v17 = vpop.permute.xlu0 %281  ;;  %v1274_v48 = vpop.permute.xlu2 %293 }
  0x90   : > { %v1246_v18 = vpop.permute.xlu1 %273  ;;  %v333_v55 = vshrl.u32 %v282_v17, 16 }
  0x91   : > { %v325_v1 = vshrl.u32 %v1246_v18, 16 }
  0x97   : > { %v286_v20 = vpop.permute.xlu0 %285 }
  0x98   : > { %v1248_v21 = vpop.permute.xlu1 %277  ;;  %v331_v28 = vpack.i.b16 %v286_v20, %v282_v17  ;;  %v334_v52 = vshrl.u32 %v286_v20, 16  ;;  %v355_v17 = vpack.i.b16 %v354_v59, %v353_v58  ;;  %v537_v20 = vsel %vm394_vm0, %v536_v2, %v363_v42 }
  0x99   : > { %v323_v22 = vpack.i.b16 %v1248_v21, %v1246_v18  ;;  %v326_v4 = vshrl.u32 %v1248_v21, 16  ;;  %v514_v59 = vrot.slane %v1306_v3, 4 }
  0x9a   : > { %v400_v36 = vrot.slane %v331_v28, 4  ;;  %v335_v6 = vpack.i.b16 %v334_v52, %v333_v55 }
  0x9b   : > { %v393_v26 = vrot.slane %v323_v22, 4  ;;  %v319_v22 = vpack.i.b16 %v318_v43, %v317_v46  ;;  %v327_v24 = vpack.i.b16 %v326_v4, %v325_v1  ;;  %v341_v46 = vshrl.u32 %v1274_v48, 16 }
  0x9c   : > { %v401_v44 = vsel %vm394_vm0, %v400_v36, %v315_v35  ;;  %v428_v23 = vrot.slane %v335_v6, 4 }
  0x9d   : > { %v395_v30 = vsel %vm394_vm0, %v393_v26, %v307_v25  ;;  %v1278_v56 = vperm.slane %v401_v44, %v1254_v29  ;;  %v422_v42 = vrot.slane %v327_v24, 4 }
  0x9e   : > { %v1266_v40 = vperm.slane %v395_v30, %v1254_v29  ;;  %v541_v30 = vperm.slane %v537_v20, %v1254_v29  ;;  %v429_v41 = vsel %vm394_vm0, %v428_v23, %v319_v22 }
  0x9f   : > { %v1257_v31 = vpop.permute.xlu0 %297  ;;  %v406_v51 = vrot.slane %v1278_v56, 4  ;;  %v1325_v52 = vperm.slane %v429_v41, %v1254_v29  ;;  %v423_v55 = vsel %vm394_vm0, %v422_v42, %v311_v13 }
  0xa0   : > { %v1259_v32 = vpop.permute.xlu1 %301  ;;  %v408_v53 = vrot.slane %v1266_v40, 4  ;;  %v346_v36 = vshrl.u32 %v1257_v31, 16  ;;  %v542_v50 = vrot.slane %v541_v30, 4  ;;  %v1335_v6 = vperm.slane %v423_v55, %v1254_v29 }
  0xa1   : > { %v345_v61 = vpack.i.b16 %v1259_v32, %v1257_v31  ;;  %v347_v37 = vshrl.u32 %v1259_v32, 16  ;;  %v292_v31 = vpop.permute.xlu2 %291  ;;  %v434_v4 = vrot.slane %v1325_v52, 4 }
  0xa2   : > { %v409_v9 = vsel %vm394_vm0, %v1278_v56, %v408_v53  ;;  %v384_v58 = vshrl.u32 %v292_v31, 16  ;;  %v436_v55 = vrot.slane %v1335_v6, 4 }
  0xa3   : > { %v459_v16 = vperm.slane %v345_v61, %v1254_v29  ;;  %v1302_v21 = vperm.slane %v409_v9, %v1290_v5  ;;  %v348_v53 = vpack.i.b16 %v347_v37, %v346_v36  ;;  %v407_v9 = vsel %vm394_vm0, %v406_v51, %v1266_v40 }
  0xa5   : > { %v638_v38 = vunpack.c.l.b16 %v1302_v21 }
  0xa7   : > { %v280_v57 = vpop.permute.xlu0 %279 }
  0xa8   : > { %v1282_v60 = vpop.permute.xlu1 %289  ;;  %v367_v62 = vpack.i.b16 %v280_v57, %v276_v27  ;;  %v370_v63 = vshrl.u32 %v280_v57, 16 }
  0xa9   : > { %v339_v0 = vpack.i.b16 %v1274_v48, %v1282_v60  ;;  %v340_v47 = vshrl.u32 %v1282_v60, 16 }
  0xaa   : > { %v371_v7 = vpack.i.b16 %v370_v63, %v369_v54  ;;  %v502_v14 = vrot.slane %v367_v62, 4  ;;  %v460_v54 = vrot.slane %v459_v16, 4 }
  0xab   : > { %v454_v8 = vperm.slane %v339_v0, %v1254_v29  ;;  %v342_v61 = vpack.i.b16 %v341_v46, %v340_v47 }
  0xac   : > { %v530_v18 = vrot.slane %v371_v7, 4  ;;  %v503_v15 = vsel %vm394_vm0, %v502_v14, %v351_v12  ;;  %v485_v7 = vperm.slane %v348_v53, %v1254_v29 }
  0xad   : > { %v462_v19 = vrot.slane %v454_v8, 4  ;;  %v507_v43 = vperm.slane %v503_v15, %v1254_v29  ;;  %v461_v62 = vsel %vm394_vm0, %v460_v54, %v454_v8 }
  0xae   : > { %v531_v33 = vsel %vm394_vm0, %v530_v18, %v355_v17  ;;  %v467_v14 = vperm.slane %v461_v62, %v1290_v5  ;;  %v486_v23 = vrot.slane %v485_v7, 4 }
  0xaf   : > { %v463_v25 = vsel %vm394_vm0, %v459_v16, %v462_v19  ;;  %v300_v26 = vpop.permute.xlu0 %299  ;;  %v535_v45 = vperm.slane %v531_v33, %v1254_v29  ;;  %v516_v57 = vrot.slane %v507_v43, 4  ;;  %v480_v16 = vperm.slane %v342_v61, %v1254_v29 }
  0xb0   : > { %v304_v27 = vpop.permute.xlu1 %303  ;;  %v1310_v28 = vperm.slane %v463_v25, %v1290_v5  ;;  %v390_v34 = vshrl.u32 %v300_v26, 16  ;;  %v413_v25 = vperm.slane %v407_v9, %v1290_v5  ;;  %v472_v37 = vrot.slane %v467_v14, 4 }
  0xb1   : > { %v391_v35 = vshrl.u32 %v304_v27, 16  ;;  %v389_v44 = vpack.i.b16 %v304_v27, %v300_v26  ;;  %v544_v60 = vrot.slane %v535_v45, 4  ;;  %v543_v2 = vsel %vm394_vm0, %v542_v50, %v535_v45 }
  0xb2   : > { %v639_v39 = vunpack.c.l.b16 %v1310_v28  ;;  %v517_v12 = vsel %vm394_vm0, %v1306_v3, %v516_v57  ;;  %v1346_v17 = vperm.slane %v543_v2, %v1290_v5  ;;  %v515_v3 = vsel %vm394_vm0, %v514_v59, %v507_v43 }
  0xb3   : > { %v392_v32 = vpack.i.b16 %v391_v35, %v390_v34  ;;  %v567_v48 = vperm.slane %v389_v44, %v1254_v29  ;;  %v545_v18 = vsel %vm394_vm0, %v541_v30, %v544_v60  ;;  %v1352_v24 = vperm.slane %v517_v12, %v1290_v5 }
  0xb4   : > { %v640_v49 = vpack.c.b16 %v639_v39, %v638_v38  ;;  %v1366_v33 = vperm.slane %v545_v18, %v1290_v5  ;;  %v487_v34 = vsel %vm394_vm0, %v486_v23, %v480_v16  ;;  %v673_v35 = vunpack.c.l.b16 %v1346_v17 }
  0xb5   : > { %v593_v63 = vperm.slane %v392_v32, %v1254_v29  ;;  %v568_v10 = vrot.slane %v567_v48, 4  ;;  %v1372_v38 = vperm.slane %v515_v3, %v1290_v5  ;;  %v694_v41 = vunpack.c.l.b16 %v1352_v24 }
  0xb6   : > { %641 = vrot.lane.b32.xlu1 %v640_v49, %s1101_s26  ;;  %v435_v44 = vsel %vm394_vm0, %v434_v4, %v1335_v6  ;;  %v1382_v45 = vperm.slane %v487_v34, %v1290_v5  ;;  %v418_v46 = vrot.slane %v413_v25, 4  ;;  %v701_v50 = vunpack.c.l.b16 %v1366_v33 }
  0xb7   : > { %v296_v56 = vpop.permute.xlu0 %295  ;;  %v594_v19 = vrot.slane %v593_v63, 4  ;;  %v488_v51 = vrot.slane %v480_v16, 4  ;;  %v473_v53 = vsel %vm394_vm0, 0, %v472_v37  ;;  %v526_v54 = vrot.slane %v1372_v38, 4 }
  0xb8   : > { %v385_v0 = vshrl.u32 %v296_v56, 16  ;;  %v383_v1 = vpack.i.b16 %v296_v56, %v292_v31  ;;  %v613_v60 = vunpack.c.l.b16 %v467_v14  ;;  %v612_v61 = vunpack.c.l.b16 %v413_v25 }
  0xb9   : > { %v618_v62 = vunpack.c.l.b16 %v1382_v45  ;;  %v625_v56 = vunpack.c.l.b16 %v473_v53 }
  0xba   : > { %v386_v11 = vpack.i.b16 %v385_v0, %v384_v58  ;;  %v562_v8 = vperm.slane %v383_v1, %v1254_v29  ;;  %v419_v58 = vsel %vm394_vm0, 0, %v418_v46  ;;  %v489_v0 = vsel %vm394_vm0, %v485_v7, %v488_v51 }
  0xbb   : > { %v1397_v2 = vpack.c.b16 %v613_v60, %v612_v61  ;;  %v624_v6 = vunpack.c.l.b16 %v419_v58  ;;  %v497_v18 = vperm.slane %v489_v0, %v1290_v5 }
  0xbc   : > { %v569_v20 = vsel %vm394_vm0, %v568_v10, %v562_v8  ;;  %v570_v40 = vrot.slane %v562_v8, 4  ;;  %v588_v22 = vperm.slane %v386_v11, %v1254_v29  ;;  %v437_v10 = vsel %vm394_vm0, %v1325_v52, %v436_v55 }
  0xbd   : > { %v1357_v13 = vperm.slane %v569_v20, %v1290_v5  ;;  %v554_v11 = vrot.slane %v1346_v17, 4  ;;  %v474_v8 = vrot.slane %v1310_v28, 4  ;;  %v626_v14 = vpack.c.b16 %v625_v56, %v624_v6 }
  0xbe   : > { %v596_v15 = vrot.slane %v588_v22, 4  ;;  %v595_v26 = vsel %vm394_vm0, %v594_v19, %v588_v22  ;;  %v571_v27 = vsel %vm394_vm0, %v567_v48, %v570_v40  ;;  %v441_v48 = vperm.slane %v435_v44, %v1290_v5 }
  0xbf   : > { %v601_v30 = vperm.slane %v595_v26, %v1290_v5  ;;  %v1363_v29 = vperm.slane %v571_v27, %v1290_v5  ;;  %v580_v47 = vrot.slane %v1357_v13, 4  ;;  %v420_v19 = vrot.slane %v1302_v21, 4 }
  0xc0   : > { %v597_v36 = vsel %vm394_vm0, %v593_v63, %v596_v15  ;;  %v527_v63 = vsel %vm394_vm0, 0, %v526_v54  ;;  %v617_v4 = vunpack.c.l.b16 %v441_v48  ;;  %v445_v52 = vperm.slane %v437_v10, %v1290_v5 }
  0xc1   : > { %v674_v39 = vunpack.c.l.b16 %v601_v30  ;;  %v695_v42 = vunpack.c.l.b16 %v1363_v29  ;;  %v1377_v43 = vperm.slane %v597_v36, %v1290_v5  ;;  %v581_v59 = vsel %vm394_vm0, 0, %v580_v47 }
  0xc2   : > { %v606_v1 = vrot.slane %v601_v30, 4  ;;  %v681_v9 = vunpack.c.l.b16 %v581_v59  ;;  %v619_v12 = vpack.c.b16 %v618_v62, %v617_v4  ;;  %v680_v16 = vunpack.c.l.b16 %v527_v63  ;;  %v809_v4 = vld [vmem:[%s1464_s3] sm:$0xff] }
  0xc3   : > { %v675_v49 = vpack.c.b16 %v674_v39, %v673_v35  ;;  %v696_v31 = vpack.c.b16 %v695_v42, %v694_v41  ;;  %v702_v32 = vunpack.c.l.b16 %v1377_v43  ;;  %v555_v17 = vsel %vm394_vm0, 0, %v554_v11 }
  0xc4   : > { %v607_v7 = vsel %vm394_vm0, 0, %v606_v1  ;;  %v682_v20 = vpack.c.b16 %v681_v9, %v680_v16  ;;  %v475_v28 = vsel %vm394_vm0, 0, %v474_v8  ;;  %v646_v40 = vunpack.c.l.b16 %v497_v18  ;;  %v801_v1 = vld [vmem:[%s1463_s2] sm:$0xff] }
  0xc5   : > { %676 = vrot.lane.b32.xlu2 %v675_v49, %s1098_s25  ;;  %697 = vrot.lane.b32.xlu1 %v696_v31, %s1102_s28  ;;  %v703_v57 = vpack.c.b16 %v702_v32, %v701_v50  ;;  %v688_v22 = vunpack.c.l.b16 %v607_v7  ;;  %v421_v23 = vsel %vm394_vm0, 0, %v420_v19  ;;  %v500_v25 = vrot.slane %v497_v18, 4  ;;  %s933_s28 = sshll.u32 %s1476_s18, 4 }
  0xc6   : > { %v645_v3 = vunpack.c.l.b16 %v445_v52  ;;  %v687_v21 = vunpack.c.l.b16 %v555_v17  ;;  %v653_v15 = vunpack.c.l.b16 %v475_v28  ;;  %v448_v26 = vrot.slane %v445_v52, 4 }
  0xc7   : > { %704 = vrot.lane.b32.xlu0 %v703_v57, %s1103_s29  ;;  %v498_v27 = vrot.slane %v1382_v45, 4  ;;  %v652_v5 = vunpack.c.l.b16 %v421_v23  ;;  %v501_v35 = vsel %vm394_vm0, 0, %v500_v25  ;;  %v446_v36 = vrot.slane %v441_v48, 4 }
  0xc8   : > { %v647_v30 = vpack.c.b16 %v646_v40, %v645_v3  ;;  %v689_v34 = vpack.c.b16 %v688_v22, %v687_v21  ;;  %v449_v39 = vsel %vm394_vm0, 0, %v448_v26  ;;  %v667_v42 = vunpack.c.l.b16 %v1357_v13 }
  0xc9   : > { %v654_v37 = vpack.c.b16 %v653_v15, %v652_v5  ;;  %v499_v41 = vsel %vm394_vm0, 0, %v498_v27  ;;  %v660_v44 = vunpack.c.l.b16 %v501_v35  ;;  %v447_v45 = vsel %vm394_vm0, 0, %v446_v36  ;;  %v766_v5 = vld [vmem:[%s1462_s1] sm:$0xf] }
  0xca   : > { %v582_v46 = vrot.slane %v1363_v29, 4  ;;  %v666_v47 = vunpack.c.l.b16 %v1372_v38  ;;  %v659_v49 = vunpack.c.l.b16 %v449_v39  ;;  %v632_v31 = vunpack.c.l.b16 %v499_v41 }
  0xcb   : > { %v528_v50 = vrot.slane %v1352_v24, 4  ;;  %v608_v32 = vrot.slane %v1377_v43, 4  ;;  %v631_v54 = vunpack.c.l.b16 %v447_v45  ;;  %v556_v13 = vrot.slane %v1366_v33, 4 }
  0xcc   : > { %v668_v51 = vpack.c.b16 %v667_v42, %v666_v47  ;;  %v661_v53 = vpack.c.b16 %v660_v44, %v659_v49  ;;  %v583_v55 = vsel %vm394_vm0, 0, %v582_v46  ;;  %v1115_v6 = vmov 0  }
  0xcd   : > { %620 = vrot.lane.b32.xlu1 %v619_v12, %s1104_s30  ;;  %627 = vrot.lane.b32.xlu2 %v626_v14, %s1105_s5  ;;  %v633_v29 = vpack.c.b16 %v632_v31, %v631_v54  ;;  %v529_v38 = vsel %vm394_vm0, 0, %v528_v50  ;;  %v609_v57 = vsel %vm394_vm0, 0, %v608_v32  ;;  %v709_v24 = vunpack.c.l.b16 %v583_v55  ;;  %s246_s5 = scalar_lea.vmem %s1465_s4, %s933_s28 }
  0xce   : > { %v557_v43 = vsel %vm394_vm0, 0, %v556_v13  ;;  %v708_v48 = vunpack.c.l.b16 %v529_v38  ;;  %v716_v58 = vunpack.c.l.b16 %v609_v57  ;;  %1010 = vset.pattern.permute.xlu1 %v1115_v6  ;;  %1011 = vset.pattern.permute.xlu2 %v1115_v6  ;;  %vm763_vm0 = vcmask 670720  }
  0xcf   : > { %683 = vrot.lane.b32.xlu0 %v682_v20, %s1106_s6  ;;  %v715_v60 = vunpack.c.l.b16 %v557_v43 }
  0xd0   : > { %v710_v59 = vpack.c.b16 %v709_v24, %v708_v48  ;;  %1012 = vset.pattern.permute.xlu0 %v1115_v6 }
  0xd1   : > { %v717_v33 = vpack.c.b16 %v716_v58, %v715_v60 }
  0xd5   : > { %648 = vrot.lane.b32.xlu1 %v647_v30, %s1107_s7  ;;  %690 = vrot.lane.b32.xlu2 %v689_v34, %s1108_s8 }
  0xd7   : > { %655 = vrot.lane.b32.xlu0 %v654_v37, %s1109_s9 }
  0xdd   : > { %669 = vrot.lane.b32.xlu1 %v668_v51, %s1110_s10  ;;  %662 = vrot.lane.b32.xlu2 %v661_v53, %s1111_s11 }
  0xdf   : > { %634 = vrot.lane.b32.xlu0 %v633_v29, %s1112_s12 }
  0xe5   : > { %711 = vrot.lane.b32.xlu2 %v710_v59, %s1113_s13  ;;  %804 = vperm.xlu1 %1010, %v801_v1  }
  0xe7   : > { %718 = vrot.lane.b32.xlu0 %v717_v33, %s1114_s14 }
  0xed   : > { %812 = vperm.xlu2 %1011, %v809_v4  }
 0x11f   : > { %v677_v61 = vpop.permute.xlu2 %676 }
 0x127   : > { %v628_v0 = vpop.permute.xlu2 %627 }
 0x128   : > { %v642_v62 = vpop.permute.xlu1 %641 }
 0x12f   : > { %v691_v11 = vpop.permute.xlu2 %690 }
 0x137   : > { %v698_v56 = vpop.permute.xlu1 %697  ;;  %v663_v16 = vpop.permute.xlu2 %662 }
 0x139   : > { %v705_v63 = vpop.permute.xlu0 %704 }
 0x13f   : > { %v621_v10 = vpop.permute.xlu1 %620  ;;  %v712_v21 = vpop.permute.xlu2 %711 }
 0x140   : > { %v723_v18 = vsel %vm720_vm2, %v1397_v2, %v621_v10  ;;  %vm820_vm2 = vcmask 785408  }
 0x141   : > { %v684_v9 = vpop.permute.xlu0 %683  ;;  %v726_v20 = vsel %vm724_vm4, %v723_v18, %v628_v0 }
 0x142   : > { %v750_v14 = vsel %vm748_vm1, %v677_v61, %v684_v9 }
 0x143   : > { %v753_v7 = vsel %vm751_vm3, %v750_v14, %v691_v11 }
 0x144   : > { %v756_v17 = vsel %vm754_vm6, %v753_v7, %v698_v56 }
 0x145   : > { %v759_v25 = vsel %vm757_vm11, %v756_v17, %v705_v63 }
 0x146   : > { %v762_v30 = vsel %vm760_vm15, %v759_v25, %v712_v21 }
 0x147   : > { %v649_v12 = vpop.permute.xlu1 %648  ;;  %v813_v39 = vpop.permute.xlu2 %812 }
 0x149   : > { %v656_v8 = vpop.permute.xlu0 %655 }
 0x14f   : > { %v670_v23 = vpop.permute.xlu1 %669 }
 0x151   : > { %v635_v19 = vpop.permute.xlu0 %634 }
 0x152   : > { %v729_v52 = vsel %vm727_vm5, %v726_v20, %v635_v19 }
 0x153   : > { %v732_v28 = vsel %vm730_vm7, %v729_v52, %v642_v62 }
 0x154   : > { %v735_v40 = vsel %vm733_vm8, %v732_v28, %v649_v12 }
 0x155   : > { %v738_v22 = vsel %vm736_vm9, %v735_v40, %v656_v8 }
 0x156   : > { %v741_v2 = vsel %vm739_vm10, %v738_v22, %v663_v16 }
 0x157   : > { %v744_v3 = vsel %vm742_vm12, %v741_v2, %v670_v23  ;;  %v805_v36 = vpop.permute.xlu1 %804 }
 0x158   : > { %v747_v15 = vsel %vm745_vm13, %v744_v3, %v677_v61 }
 0x159   : > { %v719_v26 = vpop.permute.xlu0 %718  ;;  %v771_v27 = vsel %vm770_vm14, %v747_v15, 0 }
 0x15a   : > { %782 = vmatpush.bf16.msra.mxu0 %v771_v27  ;;  %v765_v34 = vsel %vm763_vm0, %v762_v30, %v719_v26 }
 0x15b   : > { %v773_v35 = vsel %vm770_vm14, %v765_v34, 0 }
 0x15c   : > { %795 = vmatpush.bf16.msra.mxu1 %v773_v35 }
 0x15d   : > { %928 = vmatmul.msk.bf16.vlgmr.msra.gmra.mxu0 %vm748_vm1, %v766_v5 }
 0x15f   : > { %929 = vmatmul.msk.bf16.vlgmr.msra.gmra.mxu1 %vm748_vm1, %v766_v5 }
 0x1da   : > { %v784_v37 = vpop.f32.mrf.mxu0 }
 0x1db   : > { %v807_v41 = vmul.f32 %v805_v36, %v784_v37 }
 0x1dc   : > { %v797_v42 = vpop.f32.mrf.mxu1 }
 0x1dd   : > { %v808_v44 = vmul.f32 %v805_v36, %v797_v42  ;;  %v815_v45 = vadd.f32 %v813_v39, %v807_v41 }
 0x1df   : > { %v816_v46 = vadd.f32 %v813_v39, %v808_v44  ;;  %v817_v47 = vmax.f32 %v815_v45, 0.0 }
 0x1e1   : > { %v818_v49 = vmax.f32 %v816_v46, 0.0  ;;  %819 = vst [vmem:[%s246_s5] sm:$0xff] %v817_v47 }
 0x1e2   : > { %v786_v31 = vpop.f32.mrf.mxu0 }
 0x1e3   : > { %821 = vst.msk [vmem:[%s246_s5 + $0x8] sm:$0xff] %vm820_vm2, %v818_v49 }
 0x1e4   : > { %v799_v50 = vpop.f32.mrf.mxu1 }
 0x1e5 PF: > { %s17_s20 = sadd.s32 1, %s1093_s20   ;;  %s1468_s15 = smov %s1077_s16 }
 0x1e6   : > { %p14_p0 = scmp.ge.s32.totalorder %s17_s20, 4   ;;  %s1469_s16 = smov %s1081_s17 }
 0x1e7   : > { %s1470_s17 = smov %s1190_s27  ;;  %s1471_s18 = smov %s1089_s19 }
 0x1e8   : > { %s1472_s19 = smov %s1474_s22  ;;  %16 = sbr.rel (!%p14_p0) target bundleno = 4 (0x4), region = 76 }
 0x1ed   :  { %852 = vsyncpa [#allocation3], 1 }
 0x1ee   :  { %854 = vsyncpa [#allocation3 + $0x1], 1 }

</bundles_post_ra>
